<compile_context>
chip_gen: v6e
topology: v6e:2x2x1
jax: 0.10.0
libtpu: 0.0.40
codegen_flags: <defaults>
</compile_context>

<pallas_src>
import jax
import jax.numpy as jnp
from jax.experimental import pallas as pl
from jax.experimental.pallas import tpu as pltpu


def aff_kernel(x_ref, r_ref, w1_ref, b1_ref, w2_ref, b2_ref, o_ref):
    # x_ref/r_ref/o_ref blocks: (Nb, C, HW) bf16.
    # w1: (2Ci, C) bf16  = [Wl1 ; Wg1/HW]   b1: (2Ci, 1) f32 = [bl1 ; bg1/HW]
    # w2: (C, 2Ci) bf16  = 0.5*[Wl2 , Wg2]  b2: (C, 1)  f32 = 0.5*(bl2+bg2)
    nb, _, hw = x_ref.shape
    ci = w1_ref.shape[0] // 2

    for n in range(nb):                       # static, small in-block batch loop
        xf = x_ref[n].astype(jnp.float32)     # (C, HW)
        rf = r_ref[n].astype(jnp.float32)
        xa = xf + rf                          # f32, reused exactly in epilogue
        xa_bf = xa.astype(jnp.bfloat16)       # bf16 MXU operand

        # ---- stage 1 (one MXU push): local conv1 rows + global conv1 rows ----
        h_all = jnp.dot(w1_ref[...], xa_bf,
                        preferred_element_type=jnp.float32) + b1_ref[...]  # (2Ci, HW)
        h = jnp.maximum(h_all[:ci], 0.0)                                   # (Ci, HW)
        # GAP commuted past the (linear) conv+BN: spatial mean == lane-sum here
        # because 1/HW is folded into the global weight/bias rows.
        g = jnp.maximum(jnp.sum(h_all[ci:], axis=1, keepdims=True), 0.0)   # (Ci, 1)

        # ---- stage 2 (one MXU push): fused second convs of both branches ----
        hg = jnp.concatenate(
            [h, jnp.broadcast_to(g, (ci, hw))], axis=0).astype(jnp.bfloat16)  # (2Ci, HW)
        z = jnp.dot(w2_ref[...], hg,
                    preferred_element_type=jnp.float32) + b2_ref[...]      # (C, HW) == (xl+xg)/2

        # ---- fusion epilogue:  2*x*sig(2z) + 2*r*(1-sig(2z)) == xa + (x-r)*tanh(z) ----
        w = jnp.tanh(z)                                                    # EUP, f32
        o_ref[n] = (xa + (xf - rf) * w).astype(o_ref.dtype)


def fold_bn_into_conv(w, b, gamma, beta, mean, var, eps=1e-5):
    """Fold eval-mode BatchNorm into a 1x1 conv expressed as an (in, out) matmul."""
    scale = gamma / jnp.sqrt(var + eps)            # (out,)
    w_f = w * scale[None, :]                       # (in, out)
    b_f = (b - mean) * scale + beta                # (out,)
    return w_f.astype(jnp.float32), b_f.astype(jnp.float32)


def init_branch_params(key, channels, inter_channels):
    """Conv1x1(C->Ci) + BN(Ci) + ReLU + Conv1x1(Ci->C) + BN(C), folded. (in,out) layout."""
    ks = jax.random.split(key, 12)
    w1 = jax.random.normal(ks[0], (channels, inter_channels), jnp.float32) * 0.1
    b1 = jax.random.normal(ks[1], (inter_channels,), jnp.float32) * 0.1
    g1 = 1.0 + 0.1 * jax.random.normal(ks[2], (inter_channels,), jnp.float32)
    be1 = 0.1 * jax.random.normal(ks[3], (inter_channels,), jnp.float32)
    m1 = 0.1 * jax.random.normal(ks[4], (inter_channels,), jnp.float32)
    v1 = 1.0 + 0.1 * jax.random.uniform(ks[5], (inter_channels,), jnp.float32)

    w2 = jax.random.normal(ks[6], (inter_channels, channels), jnp.float32) * 0.1
    b2 = jax.random.normal(ks[7], (channels,), jnp.float32) * 0.1
    g2 = 1.0 + 0.1 * jax.random.normal(ks[8], (channels,), jnp.float32)
    be2 = 0.1 * jax.random.normal(ks[9], (channels,), jnp.float32)
    m2 = 0.1 * jax.random.normal(ks[10], (channels,), jnp.float32)
    v2 = 1.0 + 0.1 * jax.random.uniform(ks[11], (channels,), jnp.float32)

    w1f, b1f = fold_bn_into_conv(w1, b1, g1, be1, m1, v1)
    w2f, b2f = fold_bn_into_conv(w2, b2, g2, be2, m2, v2)
    return w1f, b1f, w2f, b2f


def prep_kernel_params(params, hw):
    """One-time prep: fuse/transpose both branches into two bf16 matmul operands.

    Stage 1: [Wl1 ; Wg1/HW] (2Ci, C) with bias [bl1 ; bg1/HW] -- the 1/HW mean of
    GAP commutes with the linear conv+BN and is folded into the global rows.
    Stage 2: 0.5*[Wl2 , Wg2] (C, 2Ci) with bias 0.5*(bl2+bg2) -- the 0.5 makes the
    kernel's dot output equal (xl+xg)/2 so the epilogue can use tanh directly.
    """
    wl1, bl1, wl2, bl2, wg1, bg1, wg2, bg2 = params
    inv_hw = jnp.float32(1.0 / hw)
    w1 = jnp.concatenate([wl1.T, wg1.T * inv_hw], axis=0)                  # (2Ci, C)
    b1 = jnp.concatenate([bl1, bg1 * inv_hw], axis=0).reshape(-1, 1)       # (2Ci, 1)
    w2 = 0.5 * jnp.concatenate([wl2.T, wg2.T], axis=1)                     # (C, 2Ci)
    b2 = (0.5 * (bl2 + bg2)).reshape(-1, 1)                                # (C, 1)
    return (w1.astype(jnp.bfloat16), b1.astype(jnp.float32),
            w2.astype(jnp.bfloat16), b2.astype(jnp.float32))


def _pick_block_batch(n, c, hw, bytes_per_elem=2, vmem_budget=32 << 20):
    """Largest per-step batch sub-block that (a) keeps >=2 grid steps when N>=2
    (both v7x TensorCores busy) and (b) fits 3 arrays x 2 pipeline buffers within
    a conservative scoped-VMEM budget (also safe on v7x's 64 MiB VMEM)."""
    target_steps = 2 if n >= 2 else 1
    nb = max(1, n // target_steps)
    while n % nb:
        nb -= 1
    while nb > 1 and 3 * 2 * nb * c * hw * bytes_per_elem > vmem_budget:
        nb -= 1
        while n % nb:
            nb -= 1
    return nb


def aff_forward(x_nchw, res_nchw, params):
    """x_nchw / res_nchw: (N, C, H, W) bfloat16. Returns (N, C, H, W) bfloat16."""
    N, C, H, W = x_nchw.shape
    HW = H * W
    w1, b1, w2, b2 = prep_kernel_params(params, HW)

    nb = _pick_block_batch(N, C, HW)
    grid = (N // nb,)

    # NCHW -> (N, C, HW): a pure reshape (no transpose, no extra HBM traffic).
    x = x_nchw.reshape(N, C, HW)
    r = res_nchw.reshape(N, C, HW)

    def full(a):
        rank = a.ndim
        return pl.BlockSpec(a.shape, lambda n, _r=rank: (0,) * _r)

    grid_spec = pltpu.PrefetchScalarGridSpec(
        num_scalar_prefetch=0,
        grid=grid,
        in_specs=[
            pl.BlockSpec((nb, C, HW), lambda n: (n, 0, 0)),   # x (bf16)
            pl.BlockSpec((nb, C, HW), lambda n: (n, 0, 0)),   # residual (bf16)
            full(w1), full(b1),                               # fused stage-1 conv (BN + 1/HW folded)
            full(w2), full(b2),                               # fused stage-2 conv (BN + 0.5 folded)
        ],
        out_specs=pl.BlockSpec((nb, C, HW), lambda n: (n, 0, 0)),
    )

    out = pl.pallas_call(
        aff_kernel,
        out_shape=jax.ShapeDtypeStruct((N, C, HW), jnp.bfloat16),
        grid_spec=grid_spec,
        compiler_params=pltpu.CompilerParams(
            dimension_semantics=("parallel",),   # batch axis -> both TCs on v7x
            vmem_limit_bytes=64 << 20,
        ),
    )(x, r, w1, b1, w2, b2)

    return out.reshape(N, C, H, W)


def aff_reference(x_nchw, res_nchw, params):
    """Pure-JAX f32 reference (same folded-BN eval semantics) for validation."""
    wl1, bl1, wl2, bl2, wg1, bg1, wg2, bg2 = params
    N, C, H, W = x_nchw.shape
    x = jnp.transpose(x_nchw.astype(jnp.float32).reshape(N, C, H * W), (0, 2, 1))
    r = jnp.transpose(res_nchw.astype(jnp.float32).reshape(N, C, H * W), (0, 2, 1))
    xa = x + r
    xl = jnp.maximum(xa @ wl1 + bl1, 0.0) @ wl2 + bl2
    gap = jnp.mean(xa, axis=1, keepdims=True)
    xg = jnp.maximum(gap @ wg1 + bg1, 0.0) @ wg2 + bg2
    wei = jax.nn.sigmoid(xl + xg)
    out = 2.0 * x * wei + 2.0 * r * (1.0 - wei)
    return jnp.transpose(out, (0, 2, 1)).reshape(N, C, H, W)


if __name__ == "__main__":
    channels, r_reduce = 64, 4
    inter_channels = channels // r_reduce
    N, H, W = 2, 16, 16

    key = jax.random.PRNGKey(0)
    k_x, k_res, k_local, k_global = jax.random.split(key, 4)

    # Activations live in HBM as bf16 (half the bytes on the roofline).
    x = jax.random.normal(k_x, (N, channels, H, W), jnp.float32).astype(jnp.bfloat16)
    residual = jax.random.normal(k_res, (N, channels, H, W), jnp.float32).astype(jnp.bfloat16)

    local_params = init_branch_params(k_local, channels, inter_channels)
    global_params = init_branch_params(k_global, channels, inter_channels)
    params = (*local_params, *global_params)

    out = aff_forward(x, residual, params)
    out = jax.block_until_ready(out)

    ref = aff_reference(x, residual, params)
    assert out.shape == (N, channels, H, W)
    # bf16 MXU operands (weights, xa, h) lose ~3 mantissa bits vs the all-f32
    # reference, so the tolerance is slightly wider than the pure-f32 variant.
    max_err = jnp.max(jnp.abs(out.astype(jnp.float32) - ref))
    assert jnp.allclose(out.astype(jnp.float32), ref, atol=4e-2, rtol=4e-2), \
        f"mismatch vs. JAX reference (max |err| = {max_err})"

    print("KERNEL_OK")
</pallas_src>

<mosaic_0001>
module attributes {stable_mosaic.version = 11 : i64} {
  func.func @aff_kernel(%arg0: i32, %arg1: memref<1x64x256xbf16, #tpu.memory_space<vmem>>, %arg2: memref<1x64x256xbf16, #tpu.memory_space<vmem>>, %arg3: memref<32x64xbf16, #tpu.memory_space<vmem>>, %arg4: memref<32x1xf32, #tpu.memory_space<vmem>>, %arg5: memref<64x32xbf16, #tpu.memory_space<vmem>>, %arg6: memref<64x1xf32, #tpu.memory_space<vmem>>, %arg7: memref<1x64x256xbf16, #tpu.memory_space<vmem>>) attributes {dimension_semantics = [#tpu.dimension_semantics<parallel>], iteration_bounds = array<i64: 2>, scalar_prefetch = 0 : i64, scratch_operands = 0 : i64, tpu.core_type = #tpu.core_type<tc>, window_params = [{transform_indices = @transform_0, window_bounds = array<i64: 1, 64, 256>}, {transform_indices = @transform_1, window_bounds = array<i64: 1, 64, 256>}, {pipeline_mode = #tpu.pipeline_mode<synchronous>, transform_indices = @transform_2, window_bounds = array<i64: 32, 64>}, {pipeline_mode = #tpu.pipeline_mode<synchronous>, transform_indices = @transform_3, window_bounds = array<i64: 32, 1>}, {pipeline_mode = #tpu.pipeline_mode<synchronous>, transform_indices = @transform_4, window_bounds = array<i64: 64, 32>}, {pipeline_mode = #tpu.pipeline_mode<synchronous>, transform_indices = @transform_5, window_bounds = array<i64: 64, 1>}, {transform_indices = @transform_6, window_bounds = array<i64: 1, 64, 256>}]} {
    %c0 = arith.constant 0 : index
    %c0_0 = arith.constant 0 : index
    %c0_1 = arith.constant 0 : index
    %0 = vector.load %arg1[%c0, %c0_0, %c0_1] : memref<1x64x256xbf16, #tpu.memory_space<vmem>>, vector<1x64x256xbf16>
    %1 = vector.shape_cast %0 : vector<1x64x256xbf16> to vector<64x256xbf16>
    %2 = arith.extf %1 : vector<64x256xbf16> to vector<64x256xf32>
    %c0_2 = arith.constant 0 : index
    %c0_3 = arith.constant 0 : index
    %c0_4 = arith.constant 0 : index
    %3 = vector.load %arg2[%c0_2, %c0_3, %c0_4] : memref<1x64x256xbf16, #tpu.memory_space<vmem>>, vector<1x64x256xbf16>
    %4 = vector.shape_cast %3 : vector<1x64x256xbf16> to vector<64x256xbf16>
    %5 = arith.extf %4 : vector<64x256xbf16> to vector<64x256xf32>
    %6 = arith.addf %2, %5 : vector<64x256xf32>
    %7 = arith.truncf %6 : vector<64x256xf32> to vector<64x256xbf16>
    %c0_5 = arith.constant 0 : index
    %c0_6 = arith.constant 0 : index
    %8 = vector.load %arg3[%c0_5, %c0_6] : memref<32x64xbf16, #tpu.memory_space<vmem>>, vector<32x64xbf16>
    %cst = arith.constant dense<0.000000e+00> : vector<32x256xf32>
    %9 = tpu.matmul %8, %7, %cst {dimension_numbers = #tpu.dot_dimension_numbers<[1], [0], [0], [1], [0, 0, 1, 1], [], []>} : vector<32x64xbf16>, vector<64x256xbf16>, vector<32x256xf32> -> vector<32x256xf32>
    %c0_7 = arith.constant 0 : index
    %c0_8 = arith.constant 0 : index
    %10 = vector.load %arg4[%c0_7, %c0_8] : memref<32x1xf32, #tpu.memory_space<vmem>>, vector<32x1xf32>
    %11 = vector.broadcast %10 : vector<32x1xf32> to vector<32x256xf32>
    %12 = arith.addf %9, %11 : vector<32x256xf32>
    %13 = vector.extract_strided_slice %12 {offsets = [0, 0], sizes = [16, 256], strides = [1, 1]} : vector<32x256xf32> to vector<16x256xf32>
    %cst_9 = arith.constant 0.000000e+00 : f32
    %14 = vector.broadcast %cst_9 : f32 to vector<16x256xf32>
    %15 = arith.maximumf %13, %14 : vector<16x256xf32>
    %16 = vector.extract_strided_slice %12 {offsets = [16, 0], sizes = [16, 256], strides = [1, 1]} : vector<32x256xf32> to vector<16x256xf32>
    %cst_10 = arith.constant dense<0.000000e+00> : vector<16xf32>
    %17 = vector.multi_reduction <add>, %16, %cst_10 [1] : vector<16x256xf32> to vector<16xf32>
    %18 = vector.shape_cast %17 : vector<16xf32> to vector<16x1xf32>
    %cst_11 = arith.constant 0.000000e+00 : f32
    %19 = vector.broadcast %cst_11 : f32 to vector<16x1xf32>
    %20 = arith.maximumf %18, %19 : vector<16x1xf32>
    %21 = vector.shape_cast %20 : vector<16x1xf32> to vector<16x1xf32>
    %22 = vector.broadcast %21 : vector<16x1xf32> to vector<16x256xf32>
    %23 = tpu.concatenate %15, %22 in 0 : vector<16x256xf32>, vector<16x256xf32> -> vector<32x256xf32>
    %24 = arith.truncf %23 : vector<32x256xf32> to vector<32x256xbf16>
    %c0_12 = arith.constant 0 : index
    %c0_13 = arith.constant 0 : index
    %25 = vector.load %arg5[%c0_12, %c0_13] : memref<64x32xbf16, #tpu.memory_space<vmem>>, vector<64x32xbf16>
    %cst_14 = arith.constant dense<0.000000e+00> : vector<64x256xf32>
    %26 = tpu.matmul %25, %24, %cst_14 {dimension_numbers = #tpu.dot_dimension_numbers<[1], [0], [0], [1], [0, 0, 1, 1], [], []>} : vector<64x32xbf16>, vector<32x256xbf16>, vector<64x256xf32> -> vector<64x256xf32>
    %c0_15 = arith.constant 0 : index
    %c0_16 = arith.constant 0 : index
    %27 = vector.load %arg6[%c0_15, %c0_16] : memref<64x1xf32, #tpu.memory_space<vmem>>, vector<64x1xf32>
    %28 = vector.broadcast %27 : vector<64x1xf32> to vector<64x256xf32>
    %29 = arith.addf %26, %28 : vector<64x256xf32>
    %30 = math.tanh %29 : vector<64x256xf32>
    %31 = arith.subf %2, %5 : vector<64x256xf32>
    %32 = arith.mulf %31, %30 : vector<64x256xf32>
    %33 = arith.addf %6, %32 : vector<64x256xf32>
    %34 = arith.truncf %33 : vector<64x256xf32> to vector<64x256xbf16>
    %c0_17 = arith.constant 0 : index
    %c0_18 = arith.constant 0 : index
    %c0_19 = arith.constant 0 : index
    %35 = vector.load %arg7[%c0_17, %c0_18, %c0_19] : memref<1x64x256xbf16, #tpu.memory_space<vmem>>, vector<1x64x256xbf16>
    %36 = vector.shape_cast %35 : vector<1x64x256xbf16> to vector<64x256xbf16>
    %37 = vector.shape_cast %34 : vector<64x256xbf16> to vector<1x64x256xbf16>
    tpu.vector_store %arg7[%c0_17, %c0_18, %c0_19], %37 {strides = array<i32>} : memref<1x64x256xbf16, #tpu.memory_space<vmem>>, vector<1x64x256xbf16>,
    return
  }
  func.func @transform_0(%arg0: i32) -> (i32, i32, i32) {
    %c0_i32 = arith.constant 0 : i32
    %c0_i32_0 = arith.constant 0 : i32
    %c0_i32_1 = arith.constant 0 : i32
    return %arg0, %c0_i32, %c0_i32_0 : i32, i32, i32
  }
  func.func @transform_1(%arg0: i32) -> (i32, i32, i32) {
    %c0_i32 = arith.constant 0 : i32
    %c0_i32_0 = arith.constant 0 : i32
    %c0_i32_1 = arith.constant 0 : i32
    return %arg0, %c0_i32, %c0_i32_0 : i32, i32, i32
  }
  func.func @transform_2(%arg0: i32) -> (i32, i32) {
    %c0_i32 = arith.constant 0 : i32
    %c0_i32_0 = arith.constant 0 : i32
    %c0_i32_1 = arith.constant 0 : i32
    return %c0_i32, %c0_i32_0 : i32, i32
  }
  func.func @transform_3(%arg0: i32) -> (i32, i32) {
    %c0_i32 = arith.constant 0 : i32
    %c0_i32_0 = arith.constant 0 : i32
    %c0_i32_1 = arith.constant 0 : i32
    return %c0_i32, %c0_i32_0 : i32, i32
  }
  func.func @transform_4(%arg0: i32) -> (i32, i32) {
    %c0_i32 = arith.constant 0 : i32
    %c0_i32_0 = arith.constant 0 : i32
    %c0_i32_1 = arith.constant 0 : i32
    return %c0_i32, %c0_i32_0 : i32, i32
  }
  func.func @transform_5(%arg0: i32) -> (i32, i32) {
    %c0_i32 = arith.constant 0 : i32
    %c0_i32_0 = arith.constant 0 : i32
    %c0_i32_1 = arith.constant 0 : i32
    return %c0_i32, %c0_i32_0 : i32, i32
  }
  func.func @transform_6(%arg0: i32) -> (i32, i32, i32) {
    %c0_i32 = arith.constant 0 : i32
    %c0_i32_0 = arith.constant 0 : i32
    %c0_i32_1 = arith.constant 0 : i32
    return %arg0, %c0_i32, %c0_i32_0 : i32, i32, i32
  }
}

</mosaic_0001>

<bundles_post_ra>
// kernel: tpu_custom_call.1
= control target key start
LH: loop header
LB: loop body
LE: loop exit
PB: predicated region body
PF: predicated region fallthrough
CT: control target
= control target key end

     0   :  { %11 = vsyncpa [#allocation3], 0  ;;  %s1589_s0 = inlined_call_operand.vmem [shape: bf16[2,64,256], index: 0, kind: input, shape index: {}]   ;;  %s1590_s1 = inlined_call_operand.hbm [shape: bf16[2,64,256], index: 1, kind: input, shape index: {}]   ;;  %s1591_s2 = inlined_call_operand.hbm [shape: bf16[32,64], index: 2, kind: input, shape index: {}]   ;;  %s1592_s3 = inlined_call_operand.vmem [shape: f32[32,1], index: 3, kind: input, shape index: {}]   ;;  %s1593_s4 = inlined_call_operand.vmem [shape: bf16[64,32], index: 4, kind: input, shape index: {}]   ;;  %s1594_s5 = inlined_call_operand.vmem [shape: f32[64,1], index: 5, kind: input, shape index: {}]   ;;  %s1595_s6 = inlined_call_operand.hbm [shape: bf16[2,64,256], index: 6, kind: output, shape index: {}]  }
   0x1   :  { %13 = vsyncpa [#allocation3 + $0x1], 0 }
   0x2   :  { %14 = vsyncpa [#allocation6], 0 }
   0x3   :  { %15 = vsyncpa [#allocation4], 0 }
   0x4   :  { %17 = vsyncpa [#allocation4 + $0x1], 0  ;;  %s1204_s21 = smov 0   ;;  %s1206_s22 = smov 0  }
   0x5   :  { %s1208_s23 = smov 0   ;;  %s1210_s24 = smov 0  }
   0x6 LB: > { %s1225_s25 = sadd.s32 4294967295, %s1157_s24   ;;  %s882_s26 = sadd.s32 4294967294, %s1157_s24   ;;  %s1157_s24 = sphi %s1210_s24, %s1617_s24   ;;  %s1153_s23 = sphi %s1208_s23, %s1616_s23   ;;  %s1149_s22 = sphi %s1206_s22, %s1615_s22   ;;  %s1145_s21 = sphi %s1204_s21, %s1614_s21  }
   0x7   : > { %p69_p0 = scmp.ne.s32.totalorder %s1149_s22, %s1145_s21  ;;  %p1596_p1 = scmp.eq.s32.totalorder %s1225_s25, 0 }
   0x8   : > { %p183_p3 = scmp.eq.s32.totalorder %s882_s26, 1  ;;  %p883_p5 = scmp.ge.s32.totalorder %s1157_s24, 1 }
   0x9   : > { %p1234_p4 = por %p1596_p1, %p69_p0  ;;  %p190_p7 = scmp.lt.s32.totalorder %s1157_s24, 3 }
   0xa   : > { %p1239_p6 = por %p183_p3, %p69_p0  ;;  %s1159_s30 = smov [#allocation5]  }
   0xb   : > { %s1600_s27 = scalar_select %p1234_p4, 1, 0 }
   0xc   : > { %s1601_s28 = scalar_select %p1239_p6, 1, 0 }
   0xd   : > { %p1244_p8 = pnand %p883_p5, %p190_p7  ;;  %s202_s7 = sshll.u32 %s1159_s30, 4  ;;  %s203_s7 = int_to_ptr.vmem [resolvable:$true] %s202_s7 }
   0xe   : > { %s1258_s9 = sadd.s32 1, %s1157_s24   ;;  %s56_s10 = sadd.s32 1, %s1153_s23 }
   0xf   : > { %s1602_s29 = scalar_select %p1244_p8, 1, 0 }
  0x10   : > { %p939_p9 = pneg %p1244_p8  ;;  %s53_s11 = ssub.s32 %s1157_s24, %s1258_s9 }
  0x11   : > { %s1046_s12 = scalar_lea.vmem %s203_s7, 256  ;;  %p1054_p5 = scmp.lt.s32.totalorder %s203_s7, %s203_s7 }
  0x12   : > { %p1253_p11 = pnand %p939_p9, %p1596_p1  ;;  %p1047_p13 = scmp.ne.s32.totalorder %s203_s7, %s1046_s12 }
  0x13   : > { %p1055_p7 = scmp.lt.s32.totalorder %s1046_s12, %s1046_s12 }
  0x14   : > { %p1037_p12 = pneg %p1253_p11 }
  0x15   : > { %p1056_p10 = por %p1055_p7, %p1054_p5 }
  0x16   : > { %p1049_p0 = pnand %p1047_p13, %p1037_p12 }
  0x18   : > { %p1050_p3 = pneg %p1049_p0 }
  0x1a   : > { %p1057_p2 = pnand %p1056_p10, %p1050_p3 }
  0x1c   : > { %1060 = shalt.err (!%p1057_p2)
}
  0x1d   : > { %s1160_s13 = smov 64   ;;  %s1161_s14 = smov 4  }
  0x1e   : > { %942 = dma.hbm_to_vmem [thread:$0]  (!%p1253_p11), %s1591_s2, 256, %s203_s7, [#allocation6], %s1160_s13, %s1160_s13, %s1161_s14  }
  0x1f   : > { %p54_p9 = scmp.eq.s32.totalorder %s53_s11, 0  ;;  %p63_p12 = scmp.ne.s32.totalorder %s1153_s23, %s1149_s22 }
  0x20   : > { %p64_p10 = scmp.eq.s32.totalorder %s1157_s24, 0  ;;  %p952_p2 = scmp.lt.s32.totalorder %s1157_s24, 2 }
  0x21   : > { %s1275_s17 = scalar_select %p54_p9, %s1153_s23, %s56_s10  }
  0x22   : > { %p65_p13 = por %p64_p10, %p63_p12  ;;  %p1604_p0 = scmp.eq.s32.totalorder %s1225_s25, 1 }
  0x23   : > { %s233_s19 = sand.u32 1, %s1153_s23   ;;  %s920_s20 = sshll.u32 %s1157_s24, 10 }
  0x24   : > { %p1279_p3 = por %p1604_p0, %p63_p12  ;;  %s886_s26 = sshll.u32 %s233_s19, 6 }
  0x25   : > { %s1288_s12 = scalar_lea.hbm %s1590_s1, %s920_s20  ;;  %s237_s7 = scalar_lea.vmem [#allocation2], %s886_s26 }
  0x26   : > { %s1605_s18 = scalar_select %p1279_p3, 1, 0 }
  0x27   : > { %s244_s10 = sshll.u32 %s237_s7, 4  ;;  %p1290_p11 = pnand %p952_p2, %p65_p13  ;;  %s1294_s10 = int_to_ptr.vmem [resolvable:$true] %s244_s10 }
  0x28   : > { %s1296_s13 = scalar_lea.sflag [#allocation3], %s233_s19  ;;  %s1061_s14 = scalar_lea.hbm %s1288_s12, 1024 }
  0x29   : > { %p1062_p5 = scmp.ne.s32.totalorder %s1288_s12, %s1061_s14  ;;  %p1063_p7 = pneg %p1290_p11 }
  0x2a   : > { %s1066_s20 = scalar_lea.hbm %s1590_s1, 2048  ;;  %p1067_p10 = scmp.lt.s32.totalorder %s1288_s12, %s1590_s1 }
  0x2b   : > { %p1064_p9 = pnand %p1063_p7, %p1062_p5  ;;  %p1068_p2 = scmp.lt.s32.totalorder %s1066_s20, %s1061_s14 }
  0x2d   : > { %p1065_p12 = pneg %p1064_p9  ;;  %p1069_p13 = por %p1068_p2, %p1067_p10 }
  0x2f   : > { %p1070_p0 = pnand %p1069_p13, %p1065_p12 }
  0x31   : > { %1073 = shalt.err (!%p1070_p0)
}
  0x32   : > { %s1074_s19 = scalar_lea.vmem %s1294_s10, 1024  ;;  %s1162_s8 = smov [#allocation2]  }
  0x33   : > { %p1075_p1 = scmp.ne.s32.totalorder %s1294_s10, %s1074_s19  ;;  %s1079_s7 = sshll.u32 %s1162_s8, 4  ;;  %s1080_s7 = int_to_ptr.vmem [resolvable:$false] %s1079_s7 }
  0x34   : > { %s1081_s15 = scalar_lea.vmem %s1080_s7, 2048  ;;  %p1082_p9 = scmp.lt.s32.totalorder %s1294_s10, %s1080_s7 }
  0x35   : > { %p1077_p6 = pnand %p1075_p1, %p1063_p7  ;;  %p1083_p3 = scmp.lt.s32.totalorder %s1081_s15, %s1074_s19 }
  0x37   : > { %p1078_p5 = pneg %p1077_p6  ;;  %p1084_p4 = por %p1083_p3, %p1082_p9 }
  0x39   : > { %p1085_p8 = pnand %p1084_p4, %p1078_p5 }
  0x3b   : > { %1088 = shalt.err (!%p1085_p8)
}
  0x3c   : > { %s1163_s14 = smov 128   ;;  %s1164_s16 = smov 8  }
  0x3d   : > { %946 = dma.hbm_to_vmem [thread:$0]  (!%p1290_p11), %s1288_s12, 1024, %s1294_s10, %s1296_s13, %s1163_s14, %s1163_s14, %s1164_s16  }
  0x3e   : > { %p1607_p1 = scmp.ne.s32.totalorder %s1602_s29, 0 }
  0x3f   : > { %s1320_s20 = sand.u32 (!%p1607_p1), 1, %s1149_s22   ;;  %p1608_p4 = scmp.ne.s32.totalorder (!%p1607_p1), %s1600_s27, 0 }
  0x40   : > { %256 = sbr.rel (%p1607_p1) target bundleno = 724 (0x2d4), region = 44  ;;  %s890_s26 = sshll.u32 (!%p1607_p1), %s1320_s20, 6 }
  0x41   : > { %s259_s30 = scalar_lea.sflag (!%p1607_p1), [#allocation3], %s1320_s20  ;;  %s1326_s19 = scalar_lea.vmem (!%p1607_p1), [#allocation2], %s890_s26 }
  0x45   : > { %1132 = dma.done.wait (%p1608_p4), %s259_s30, 1024  }
  0x46   : > { %1134 = vsyncadd (%p1608_p4), %s259_s30, 4294966272  ;;  %p1609_p6 = scmp.eq.s32.totalorder %s1225_s25, 0 }
  0x48   : > { %1136 = dma.done.wait (%p1609_p6), [#allocation6], 256   ;;  %p1610_p8 = pmov %p1609_p6 }
  0x49   : > { %p300_p3 = scmp.lt.s32.totalorder %s1225_s25, 1  ;;  %v1165_v0 = vmov 0   ;;  %v336_v3 = vld [vmem:[%s1326_s19 + $0x30] sm:$0xff]  ;;  %v337_v6 = vld [vmem:[%s1326_s19 + $0x38] sm:$0xff]  ;;  %v334_v15 = vld [vmem:[%s1326_s19 + $0x20] sm:$0xff]  ;;  %vm416_vm0 = vcmask 523264  }
  0x4a   : > { %1138 = vsyncadd (%p1610_p8), [#allocation6], 4294967040  ;;  %455 = vmatprep.mubr.bf16.mxu0 %v1165_v0  ;;  %995 = vset.pattern.permute.xlu0 %v1165_v0  ;;  %v351_v7 = vunpack.c.h.bf16 %v336_v3  ;;  %v353_v11 = vunpack.c.h.bf16 %v337_v6  ;;  %v350_v13 = vunpack.c.l.bf16 %v336_v3  ;;  %v352_v14 = vunpack.c.l.bf16 %v337_v6  ;;  %v335_v16 = vld [vmem:[%s1326_s19 + $0x28] sm:$0xff]  ;;  %v332_v31 = vld [vmem:[%s1326_s19 + $0x10] sm:$0xff]  ;;  %s1503_s30 = scalar_lea.vmem [#allocation7], %s890_s26  ;;  %s930_s26 = sshll.u32 %s1225_s25, 10 }
  0x4b   : > { %s301_s29 = scalar_select %p300_p3, %s1225_s25, 1  ;;  %996 = vset.pattern.permute.xlu1 %v1165_v0  ;;  %612 = vmatprep.mubr.bf16.mxu1 %v1165_v0  ;;  %v347_v29 = vunpack.c.h.bf16 %v334_v15  ;;  %v349_v30 = vunpack.c.h.bf16 %v335_v16  ;;  %v333_v36 = vld [vmem:[%s1326_s19 + $0x18] sm:$0xff]  ;;  %v384_v41 = vld [vmem:[%s1592_s3 + $0x10] sm:$0xff]  ;;  %v346_v42 = vunpack.c.l.bf16 %v334_v15  ;;  %v348_v43 = vunpack.c.l.bf16 %v335_v16  ;;  %v330_v52 = vld [vmem:[%s1326_s19] sm:$0xff] }
  0x4c   : > { %398 = vperm.xlu0 %995, %v384_v41   ;;  %v343_v48 = vunpack.c.h.bf16 %v332_v31  ;;  %v345_v49 = vunpack.c.h.bf16 %v333_v36  ;;  %v385_v53 = vld [vmem:[%s1592_s3 + $0x18] sm:$0xff]  ;;  %v331_v58 = vld [vmem:[%s1326_s19 + $0x8] sm:$0xff]  ;;  %v344_v3 = vunpack.c.l.bf16 %v333_v36  ;;  %vm567_vm1 = vcmask 261120   ;;  %s787_s19 = sshll.u32 %s1503_s30, 4  ;;  %s1543_s12 = scalar_lea.hbm %s1595_s6, %s930_s26  ;;  %s1545_s19 = int_to_ptr.vmem [resolvable:$true] %s787_s19 }
  0x4d   : > { %s921_s27 = sshll.u32 %s301_s29, 6  ;;  %s774_s10 = scalar_lea.sflag [#allocation4], %s1320_s20 }
  0x4e   : > { %s1345_s11 = scalar_lea.vmem %s1589_s0, %s921_s27  ;;  %s1089_s25 = scalar_lea.vmem %s1545_s19, 1024 }
  0x4f   : > { %v312_v1 = vld [vmem:[%s1345_s11 + $0x30] sm:$0xff]  ;;  %v313_v2 = vld [vmem:[%s1345_s11 + $0x38] sm:$0xff]  ;;  %v310_v9 = vld [vmem:[%s1345_s11 + $0x20] sm:$0xff]  ;;  %p1090_p11 = scmp.ne.s32.totalorder %s1545_s19, %s1089_s25  ;;  %p1611_p7 = scmp.ne.s32.totalorder %s1605_s18, 0 }
  0x50   : > { %v327_v4 = vunpack.c.h.bf16 %v312_v1  ;;  %v329_v5 = vunpack.c.h.bf16 %v313_v2  ;;  %v326_v8 = vunpack.c.l.bf16 %v312_v1  ;;  %v311_v10 = vld [vmem:[%s1345_s11 + $0x28] sm:$0xff]  ;;  %v328_v12 = vunpack.c.l.bf16 %v313_v2  ;;  %v308_v25 = vld [vmem:[%s1345_s11 + $0x10] sm:$0xff]  ;;  %v309_v26 = vld [vmem:[%s1345_s11 + $0x18] sm:$0xff]  ;;  %403 = vperm.xlu0 %995, %v385_v53  }
  0x51   : > { %v323_v19 = vunpack.c.h.bf16 %v310_v9  ;;  %v325_v20 = vunpack.c.h.bf16 %v311_v10  ;;  %v322_v34 = vunpack.c.l.bf16 %v310_v9  ;;  %v324_v35 = vunpack.c.l.bf16 %v311_v10  ;;  %v306_v46 = vld [vmem:[%s1345_s11] sm:$0xff]  ;;  %v307_v51 = vld [vmem:[%s1345_s11 + $0x8] sm:$0xff]  ;;  %p1091_p12 = pnand %p1090_p11, %p1611_p7  ;;  %s1166_s11 = smov [#allocation7]  }
  0x52   : > { %v1355_v17 = vadd.f32 %v351_v7, %v327_v4  ;;  %v1357_v18 = vsub.f32 %v327_v4, %v351_v7  ;;  %v1359_v21 = vadd.f32 %v353_v11, %v329_v5  ;;  %v1361_v22 = vsub.f32 %v329_v5, %v353_v11  ;;  %s1093_s13 = sshll.u32 %s1166_s11, 4  ;;  %s1094_s13 = int_to_ptr.vmem [resolvable:$false] %s1093_s13 }
  0x53   : > { %v1363_v23 = vadd.f32 %v350_v13, %v326_v8  ;;  %v1365_v24 = vadd.f32 %v352_v14, %v328_v12  ;;  %v1369_v27 = vsub.f32 %v326_v8, %v350_v13  ;;  %v1371_v28 = vsub.f32 %v328_v12, %v352_v14  ;;  %v382_v8 = vld [vmem:[%s1592_s3] sm:$0xff]  ;;  %p1092_p10 = pneg %p1091_p12  ;;  %s1095_s8 = scalar_lea.vmem %s1094_s13, 2048 }
  0x54   : > { %v377_v32 = vpack.c.bf16 %v1359_v21, %v1355_v17  ;;  %v1379_v37 = vadd.f32 %v347_v29, %v323_v19  ;;  %v1381_v38 = vadd.f32 %v349_v30, %v325_v20  ;;  %v1383_v39 = vsub.f32 %v323_v19, %v347_v29  ;;  %388 = vperm.xlu0 %995, %v382_v8   ;;  %p1096_p2 = scmp.lt.s32.totalorder %s1545_s19, %s1094_s13  ;;  %p1097_p13 = scmp.lt.s32.totalorder %s1095_s8, %s1089_s25 }
  0x55   : > { %v376_v33 = vpack.c.bf16 %v1365_v24, %v1363_v23  ;;  %v1385_v40 = vsub.f32 %v325_v20, %v349_v30  ;;  %v319_v44 = vunpack.c.h.bf16 %v308_v25  ;;  %v321_v45 = vunpack.c.h.bf16 %v309_v26 }
  0x56   : > { %431 = vmatprep.subr.bf16.mxu0 %v377_v32  ;;  %v375_v47 = vpack.c.bf16 %v1381_v38, %v1379_v37  ;;  %v318_v50 = vunpack.c.l.bf16 %v308_v25  ;;  %v1398_v54 = vadd.f32 %v346_v42, %v322_v34  ;;  %v1400_v55 = vadd.f32 %v348_v43, %v324_v35  ;;  %p1098_p0 = por %p1097_p13, %p1096_p2 }
  0x57   : > { %432 = vmatpush1.bf16.msra.mxu0 %v376_v33  ;;  %v1402_v56 = vsub.f32 %v322_v34, %v346_v42  ;;  %v1404_v57 = vsub.f32 %v324_v35, %v348_v43  ;;  %v1407_v59 = vadd.f32 %v343_v48, %v319_v44  ;;  %v1409_v60 = vadd.f32 %v345_v49, %v321_v45  ;;  %v997_v42 = vld [vmem:[#allocation5] sm:$0xff]   ;;  %v500_v43 = vld [vmem:[%s1594_s5 + $0x8] sm:$0xff] }
  0x58   : > { %433 = vmatprep.subr.bf16.mxu0 %v375_v47  ;;  %v1411_v61 = vsub.f32 %v319_v44, %v343_v48  ;;  %v1413_v62 = vsub.f32 %v321_v45, %v345_v49  ;;  %v374_v63 = vpack.c.bf16 %v1400_v55, %v1398_v54  ;;  %v320_v1 = vunpack.c.l.bf16 %v309_v26  ;;  %v501_v44 = vld [vmem:[%s1594_s5 + $0x10] sm:$0xff]  ;;  %v998_v45 = vld [vmem:[#allocation5 + $0x8] sm:$0xff]   ;;  %v506_v48 = vld [vmem:[%s1594_s5 + $0x38] sm:$0xff]  ;;  %p1099_p5 = pnand %p1098_p0, %p1092_p10 }
  0x59   : > { %v342_v2 = vunpack.c.l.bf16 %v332_v31  ;;  %v373_v4 = vpack.c.bf16 %v1409_v60, %v1407_v59  ;;  %v315_v5 = vunpack.c.h.bf16 %v306_v46  ;;  %v317_v6 = vunpack.c.h.bf16 %v307_v51  ;;  %v499_v31 = vld [vmem:[%s1594_s5] sm:$0xff]  ;;  %v504_v47 = vld [vmem:[%s1594_s5 + $0x28] sm:$0xff] }
  0x5a   : > { %v339_v7 = vunpack.c.h.bf16 %v330_v52  ;;  %v1424_v10 = vadd.f32 %v344_v3, %v320_v1  ;;  %v1428_v12 = vsub.f32 %v320_v1, %v344_v3  ;;  %v341_v13 = vunpack.c.h.bf16 %v331_v58  ;;  %509 = vperm.xlu0 %995, %v499_v31  }
  0x5b   : > { %434 = vmatpush1.bf16.msra.mxu0 %v374_v63  ;;  %v1422_v9 = vadd.f32 %v342_v2, %v318_v50  ;;  %v1426_v11 = vsub.f32 %v318_v50, %v342_v2  ;;  %v314_v16 = vunpack.c.l.bf16 %v306_v46  ;;  %v316_v20 = vunpack.c.l.bf16 %v307_v51  ;;  %v502_v46 = vld [vmem:[%s1594_s5 + $0x18] sm:$0xff] }
  0x5c   : > { %435 = vmatprep.subr.bf16.mxu0 %v373_v4  ;;  %v1430_v14 = vadd.f32 %v339_v7, %v315_v5  ;;  %v1432_v15 = vsub.f32 %v315_v5, %v339_v7  ;;  %v338_v25 = vunpack.c.l.bf16 %v330_v52  ;;  %v340_v26 = vunpack.c.l.bf16 %v331_v58 }
  0x5d   : > { %v372_v19 = vpack.c.bf16 %v1424_v10, %v1422_v9  ;;  %v1436_v29 = vadd.f32 %v341_v13, %v317_v6  ;;  %v1438_v30 = vsub.f32 %v317_v6, %v341_v13 }
  0x5e   : > { %v1443_v32 = vadd.f32 %v338_v25, %v314_v16  ;;  %v1445_v33 = vadd.f32 %v340_v26, %v316_v20  ;;  %v1447_v34 = vsub.f32 %v314_v16, %v338_v25  ;;  %v1449_v35 = vsub.f32 %v316_v20, %v340_v26  ;;  %514 = vperm.xlu0 %995, %v500_v43   ;;  %v383_v16 = vld [vmem:[%s1592_s3 + $0x8] sm:$0xff]  ;;  %v505_v20 = vld [vmem:[%s1594_s5 + $0x30] sm:$0xff] }
  0x5f   : > { %436 = vmatpush1.bf16.msra.mxu0 %v372_v19  ;;  %v371_v36 = vpack.c.bf16 %v1436_v29, %v1430_v14  ;;  %v503_v19 = vld [vmem:[%s1594_s5 + $0x20] sm:$0xff] }
  0x60   : > { %v370_v41 = vpack.c.bf16 %v1445_v33, %v1443_v32 }
  0x61   : > { %437 = vmatprep.subr.bf16.mxu0 %v371_v36 }
  0x62   : > { %519 = vperm.xlu0 %995, %v501_v44  }
  0x63   : > { %438 = vmatpush1.bf16.msra.mxu0 %v370_v41 }
  0x66   : > { %897 = vmatmul.mubr.msk.bf16.vlgmr.msra.gmra.mxu0 %vm416_vm0, %v997_v42  ;;  %524 = vperm.xlu0 %995, %v502_v46  }
  0x67   : > { %465 = vmatprep.mubr.bf16.mxu0 %v1165_v0 }
  0x6a   : > { %534 = vperm.xlu0 %995, %v504_v47  }
  0x6e   : > { %898 = vmatmul.mubr.msk.bf16.gmra.mxu0 %vm416_vm0, %v998_v45  ;;  %544 = vperm.xlu0 %995, %v506_v48  }
  0xc7   : > { %v399_v53 = vpop.permute.xlu0 %398 }
  0xcb   : > { %v404_v5 = vpop.permute.xlu0 %403 }
  0xcf   : > { %v389_v41 = vpop.permute.xlu0 %388 }
 0x126   : > { %v457_v49 = vpop.f32.mrf.mxu0 }
 0x127   : > { %v458_v42 = vadd.f32 %v457_v49, %v389_v41  ;;  %v1000_v49 = vld [vmem:[%s1593_s4 + $0x8] sm:$0xff]  }
 0x128   : > { %v459_v50 = vpop.f32.mrf.mxu0 }
 0x129   : > { %v460_v43 = vadd.f32 %v459_v50, %v389_v41  ;;  %v476_v48 = vmax.f32 %v458_v42, 0.0  ;;  %v1001_v50 = vld [vmem:[%s1593_s4 + $0x10] sm:$0xff]  }
 0x12a   : > { %v461_v51 = vpop.f32.mrf.mxu0 }
 0x12c   : > { %v463_v52 = vpop.f32.mrf.mxu0 }
 0x12e   : > { %v467_v58 = vpop.f32.mrf.mxu0 }
 0x12f   : > { %v468_v1 = vadd.f32 %v467_v58, %v399_v53 }
 0x130   : > { %v469_v63 = vpop.f32.mrf.mxu0 }
 0x131   : > { %v470_v2 = vadd.f32 %v469_v63, %v399_v53  ;;  %v477_v53 = vmax.f32 %v460_v43, 0.0 }
 0x132   : > { %v471_v3 = vpop.f32.mrf.mxu0 }
 0x133   : > { %v480_v4 = vadd.f32 %v470_v2, %v468_v1  ;;  %v472_v7 = vadd.f32 %v471_v3, %v404_v5  ;;  %v999_v3 = vld [vmem:[%s1593_s4] sm:$0xff]  }
 0x134   : > { %v473_v6 = vpop.f32.mrf.mxu0 }
 0x135   : > { %v474_v8 = vadd.f32 %v473_v6, %v404_v5  ;;  %481 = vadd.xlane.f32.xlu1 %v480_v4 }
 0x137   : > { %v483_v13 = vadd.f32 %v474_v8, %v472_v7 }
 0x139   : > { %484 = vadd.xlane.f32.xlu1 %v483_v13 }
 0x14a   : > { %393 = vperm.xlu1 %996, %v383_v16  }
 0x14e   : > { %529 = vperm.xlu1 %996, %v503_v19  }
 0x152   : > { %539 = vperm.xlu1 %996, %v505_v20  }
 0x1be   : > { %v482_v25 = vpop.xlane.xlu1 %481 }
 0x1bf   : > { %v486_v31 = vmax.f32 %v482_v25, 0.0 }
 0x1c2   : > { %v485_v26 = vpop.xlane.xlu1 %484 }
 0x1c3   : > { %v487_v36 = vmax.f32 %v485_v26, 0.0 }
 0x1c5   : > { %v490_v44 = vpack.c.bf16 %v487_v36, %v486_v31 }
 0x1c6   : > { %v394_v45 = vpop.permute.xlu1 %393 }
 0x1c7   : > { %v462_v46 = vadd.f32 %v461_v51, %v394_v45  ;;  %v464_v47 = vadd.f32 %v463_v52, %v394_v45  ;;  %592 = vmatprep.subr.bf16.mxu1 %v490_v44  ;;  %v1002_v51 = vld [vmem:[%s1593_s4 + $0x18] sm:$0xff]   ;;  %v510_v52 = vpop.permute.xlu0 %509 }
 0x1c8   : > { %593 = vmatpush1.bf16.msra.mxu1 %v490_v44 }
 0x1c9   : > { %v478_v58 = vmax.f32 %v462_v46, 0.0  ;;  %v479_v63 = vmax.f32 %v464_v47, 0.0 }
 0x1ca   : > { %v530_v47 = vpop.permute.xlu1 %529 }
 0x1cb   : > { %v489_v1 = vpack.c.bf16 %v479_v63, %v477_v53  ;;  %v488_v2 = vpack.c.bf16 %v478_v58, %v476_v48  ;;  %v515_v4 = vpop.permute.xlu0 %514 }
 0x1cd   : > { %594 = vmatprep.subr.bf16.mxu1 %v489_v1 }
 0x1ce   : > { %595 = vmatpush1.bf16.msra.mxu1 %v488_v2 }
 0x1cf   : > { %v520_v19 = vpop.permute.xlu0 %519 }
 0x1d1   : > { %903 = vmatmul.mubr.msk.bf16.vlgmr.msra.gmra.mxu1 %vm567_vm1, %v999_v3 }
 0x1d2   : > { %622 = vmatprep.mubr.bf16.mxu1 %v1165_v0 }
 0x1d3   : > { %v525_v41 = vpop.permute.xlu0 %524 }
 0x1d9   : > { %904 = vmatmul.mubr.msk.bf16.gmra.mxu1 %vm567_vm1, %v1000_v49 }
 0x1da   : > { %632 = vmatprep.mubr.bf16.mxu1 %v1165_v0 }
 0x1e1   : > { %905 = vmatmul.mubr.msk.bf16.gmra.mxu1 %vm567_vm1, %v1001_v50  ;;  %v535_v50 = vpop.permute.xlu0 %534 }
 0x1e2   : > { %642 = vmatprep.mubr.bf16.mxu1 %v1165_v0 }
 0x1e9   : > { %906 = vmatmul.mubr.msk.bf16.gmra.mxu1 %vm567_vm1, %v1002_v51 }
 0x291   : > { %v614_v5 = vpop.f32.mrf.mxu1 }
 0x292   : > { %v615_v6 = vadd.f32 %v614_v5, %v510_v52 }
 0x293   : > { %v616_v7 = vpop.f32.mrf.mxu1 }
 0x294   : > { %1003 = vtanh.f32 %v615_v6  ;;  %v617_v8 = vadd.f32 %v616_v7, %v510_v52 }
 0x295   : > { %v618_v13 = vpop.f32.mrf.mxu1 }
 0x296   : > { %1005 = vtanh.f32 %v617_v8  ;;  %v619_v16 = vadd.f32 %v618_v13, %v515_v4 }
 0x297   : > { %v620_v20 = vpop.f32.mrf.mxu1 }
 0x298   : > { %1007 = vtanh.f32 %v619_v16  ;;  %v621_v25 = vadd.f32 %v620_v20, %v515_v4  ;;  %v540_v16 = vpop.permute.xlu1 %539 }
 0x299   : > { %v624_v0 = vpop.f32.mrf.mxu1 }
 0x29a   : > { %1009 = vtanh.f32 %v621_v25  ;;  %v625_v26 = vadd.f32 %v624_v0, %v520_v19 }
 0x29b   : > { %v626_v31 = vpop.f32.mrf.mxu1 }
 0x29c   : > { %1011 = vtanh.f32 %v625_v26  ;;  %v627_v36 = vadd.f32 %v626_v31, %v520_v19 }
 0x29d   : > { %v628_v42 = vpop.f32.mrf.mxu1 }
 0x29e   : > { %1013 = vtanh.f32 %v627_v36  ;;  %v629_v43 = vadd.f32 %v628_v42, %v525_v41 }
 0x29f   : > { %v630_v44 = vpop.f32.mrf.mxu1 }
 0x2a0   : > { %1015 = vtanh.f32 %v629_v43  ;;  %v631_v45 = vadd.f32 %v630_v44, %v525_v41  ;;  %v545_v41 = vpop.permute.xlu0 %544 }
 0x2a1   : > { %v1004_v46 = vpop.eup %1003  ;;  %v634_v48 = vpop.f32.mrf.mxu1 }
 0x2a2   : > { %v685_v53 = vmul.f32 %v1004_v46, %v1447_v34  ;;  %1017 = vtanh.f32 %v631_v45  ;;  %v635_v58 = vadd.f32 %v634_v48, %v530_v47 }
 0x2a3   : > { %v1006_v63 = vpop.eup %1005  ;;  %v636_v1 = vpop.f32.mrf.mxu1 }
 0x2a4   : > { %v686_v2 = vmul.f32 %v1006_v63, %v1432_v15  ;;  %1019 = vtanh.f32 %v635_v58  ;;  %v637_v3 = vadd.f32 %v636_v1, %v530_v47  ;;  %v701_v51 = vadd.f32 %v685_v53, %v1443_v32 }
 0x2a5   : > { %v1008_v49 = vpop.eup %1007  ;;  %v638_v52 = vpop.f32.mrf.mxu1 }
 0x2a6   : > { %v702_v4 = vadd.f32 %v686_v2, %v1430_v14  ;;  %v687_v5 = vmul.f32 %v1008_v49, %v1449_v35  ;;  %1021 = vtanh.f32 %v637_v3  ;;  %v639_v34 = vadd.f32 %v638_v52, %v535_v50 }
 0x2a7   : > { %v1010_v6 = vpop.eup %1009  ;;  %v640_v7 = vpop.f32.mrf.mxu1 }
 0x2a8   : > { %v922_v8 = vpack.c.bf16 %v702_v4, %v701_v51  ;;  %v688_v13 = vmul.f32 %v1010_v6, %v1438_v30  ;;  %1023 = vtanh.f32 %v639_v34  ;;  %v641_v19 = vadd.f32 %v640_v7, %v535_v50 }
 0x2a9   : > { %v1012_v15 = vpop.eup %1011  ;;  %v644_v20 = vpop.f32.mrf.mxu1  ;;  %v703_v14 = vadd.f32 %v687_v5, %v1445_v33 }
 0x2aa   : > { %765 = vst [vmem:[%s1503_s30] sm:$0xff] %v922_v8  ;;  %v704_v32 = vadd.f32 %v688_v13, %v1436_v29  ;;  %v689_v35 = vmul.f32 %v1012_v15, %v1426_v11  ;;  %v645_v25 = vadd.f32 %v644_v20, %v540_v16  ;;  %1025 = vtanh.f32 %v641_v19 }
 0x2ab   : > { %v1014_v0 = vpop.eup %1013  ;;  %v646_v30 = vpop.f32.mrf.mxu1 }
 0x2ac   : > { %v923_v26 = vpack.c.bf16 %v704_v32, %v703_v14  ;;  %v690_v31 = vmul.f32 %v1014_v0, %v1411_v61  ;;  %1027 = vtanh.f32 %v645_v25  ;;  %v647_v42 = vadd.f32 %v646_v30, %v540_v16 }
 0x2ad   : > { %v1016_v36 = vpop.eup %1015  ;;  %v648_v43 = vpop.f32.mrf.mxu1  ;;  %v705_v33 = vadd.f32 %v689_v35, %v1422_v9 }
 0x2ae   : > { %766 = vst [vmem:[%s1503_s30 + $0x8] sm:$0xff] %v923_v26  ;;  %v706_v29 = vadd.f32 %v690_v31, %v1407_v59  ;;  %v691_v11 = vmul.f32 %v1016_v36, %v1428_v12  ;;  %v649_v44 = vadd.f32 %v648_v43, %v545_v41  ;;  %1029 = vtanh.f32 %v647_v42 }
 0x2af   : > { %v1018_v45 = vpop.eup %1017  ;;  %v650_v46 = vpop.f32.mrf.mxu1 }
 0x2b0   : > { %v924_v47 = vpack.c.bf16 %v706_v29, %v705_v33  ;;  %v692_v61 = vmul.f32 %v1018_v45, %v1413_v62  ;;  %1031 = vtanh.f32 %v649_v44  ;;  %v651_v53 = vadd.f32 %v650_v46, %v545_v41 }
 0x2b1   : > { %v1020_v48 = vpop.eup %1019  ;;  %v707_v58 = vadd.f32 %v691_v11, %v1424_v10 }
 0x2b2   : > { %767 = vst [vmem:[%s1503_s30 + $0x10] sm:$0xff] %v924_v47  ;;  %v708_v9 = vadd.f32 %v692_v61, %v1409_v60  ;;  %v693_v59 = vmul.f32 %v1020_v48, %v1402_v56  ;;  %1033 = vtanh.f32 %v651_v53 }
 0x2b3   : > { %v1022_v12 = vpop.eup %1021 }
 0x2b4   : > { %v925_v63 = vpack.c.bf16 %v708_v9, %v707_v58  ;;  %v694_v1 = vmul.f32 %v1022_v12, %v1383_v39  ;;  %v709_v62 = vadd.f32 %v693_v59, %v1398_v54 }
 0x2b5   : > { %v1024_v2 = vpop.eup %1023 }
 0x2b6   : > { %768 = vst [vmem:[%s1503_s30 + $0x18] sm:$0xff] %v925_v63  ;;  %v710_v3 = vadd.f32 %v694_v1, %v1379_v37  ;;  %v695_v49 = vmul.f32 %v1024_v2, %v1404_v57 }
 0x2b7   : > { %v1026_v10 = vpop.eup %1025 }
 0x2b8   : > { %v926_v50 = vpack.c.bf16 %v710_v3, %v709_v62  ;;  %v696_v60 = vmul.f32 %v1026_v10, %v1385_v40  ;;  %v711_v56 = vadd.f32 %v695_v49, %v1400_v55 }
 0x2b9   : > { %v1028_v51 = vpop.eup %1027 }
 0x2ba   : > { %769 = vst [vmem:[%s1503_s30 + $0x20] sm:$0xff] %v926_v50  ;;  %v712_v39 = vadd.f32 %v696_v60, %v1381_v38  ;;  %v697_v52 = vmul.f32 %v1028_v51, %v1369_v27 }
 0x2bb   : > { %v1030_v54 = vpop.eup %1029 }
 0x2bc   : > { %v927_v37 = vpack.c.bf16 %v712_v39, %v711_v56  ;;  %v698_v57 = vmul.f32 %v1030_v54, %v1357_v18  ;;  %v713_v40 = vadd.f32 %v697_v52, %v1363_v23 }
 0x2bd   : > { %v1032_v4 = vpop.eup %1031 }
 0x2be   : > { %770 = vst [vmem:[%s1503_s30 + $0x28] sm:$0xff] %v927_v37  ;;  %v714_v5 = vadd.f32 %v698_v57, %v1355_v17  ;;  %v699_v34 = vmul.f32 %v1032_v4, %v1371_v28 }
 0x2bf   : > { %v1034_v55 = vpop.eup %1033 }
 0x2c0   : > { %v928_v6 = vpack.c.bf16 %v714_v5, %v713_v40  ;;  %v700_v38 = vmul.f32 %v1034_v55, %v1361_v22  ;;  %v715_v27 = vadd.f32 %v699_v34, %v1365_v24 }
 0x2c2   : > { %771 = vst [vmem:[%s1503_s30 + $0x30] sm:$0xff] %v928_v6  ;;  %v716_v18 = vadd.f32 %v700_v38, %v1359_v21 }
 0x2c4   : > { %v929_v17 = vpack.c.bf16 %v716_v18, %v715_v27 }
 0x2c6   : > { %772 = vst [vmem:[%s1503_s30 + $0x38] sm:$0xff] %v929_v17 }
 0x2c7   : > { %1102 = shalt.err (!%p1099_p5)
}
 0x2c8   : > { %s1103_s7 = scalar_lea.hbm %s1543_s12, 1024  ;;  %s1107_s16 = scalar_lea.hbm %s1595_s6, 2048 }
 0x2c9   : > { %p1104_p9 = scmp.ne.s32.totalorder %s1543_s12, %s1103_s7  ;;  %p1108_p6 = scmp.lt.s32.totalorder %s1543_s12, %s1595_s6 }
 0x2ca   : > { %p1109_p8 = scmp.lt.s32.totalorder %s1107_s16, %s1103_s7 }
 0x2cb   : > { %p1105_p1 = pnand %p1104_p9, %p1611_p7 }
 0x2cc   : > { %p1110_p3 = por %p1109_p8, %p1108_p6 }
 0x2cd   : > { %p1106_p4 = pneg %p1105_p1 }
 0x2cf   : > { %p1111_p11 = pnand %p1110_p3, %p1106_p4 }
 0x2d1   : > { %1114 = shalt.err (!%p1111_p11)
}
 0x2d2   : > { %s1167_s29 = smov 128   ;;  %s1168_s27 = smov 8  }
 0x2d3   : > { %937 = dma.vmem_to_hbm [thread:$0]  (%p1611_p7), %s1545_s19, 1024, %s1543_s12, %s774_s10, %s1167_s29, %s1167_s29, %s1168_s27  }
 0x2d4 PF: > { %s802_s25 = sand.u32 1, %s1145_s21   ;;  %p1612_p12 = scmp.ne.s32.totalorder %s1601_s28, 0 }
 0x2d5   : > { %p1613_p10 = scmp.ge.s32.totalorder %s1157_s24, 2  ;;  %s803_s11 = scalar_lea.sflag [#allocation4], %s802_s25 }
 0x2d7   : > { %p948_p2 = pnand %p1613_p10, %p1612_p12 }
 0x2d9   : > { %p949_p13 = pneg %p948_p2 }
 0x2db   : > { %1140 = dma.done.wait (%p949_p13), %s803_s11, 1024  }
 0x2dc   : > { %1142 = vsyncadd (%p949_p13), %s803_s11, 4294966272  ;;  %p20_p0 = scmp.ge.s32.totalorder %s1258_s9, 4   ;;  %s1614_s21 = smov %s1149_s22 }
 0x2dd   : > { %s1615_s22 = smov %s1153_s23  ;;  %s1616_s23 = smov %s1275_s17 }
 0x2de   : > { %s1617_s24 = smov %s1258_s9  ;;  %22 = sbr.rel (!%p20_p0) target bundleno = 6 (0x6), region = 96 }
 0x2e3   :  { %808 = vsyncpa [#allocation3], 1 }
 0x2e4   :  { %810 = vsyncpa [#allocation3 + $0x1], 1 }
 0x2e5   :  { %811 = vsyncpa [#allocation6], 1 }
 0x2e6   :  { %812 = vsyncpa [#allocation4], 1 }
 0x2e7   :  { %814 = vsyncpa [#allocation4 + $0x1], 1 }

</bundles_post_ra>
